<compile_context>
chip_gen: v7x
topology: tpu7x:2x2x1
jax: 0.10.0
libtpu: 0.0.40
codegen_flags: <defaults>
</compile_context>

<pallas_src>
import functools

import jax
import jax.numpy as jnp
from jax.experimental import pallas as pl
from jax.experimental.pallas import tpu as pltpu


def _round_up(v, m):
    return ((v + m - 1) // m) * m


def _auto_config():
    """Generation-conditional (node_tile, edge_tile, vmem_limit_bytes)."""
    vmem_cap = None
    try:
        vmem_cap = int(pltpu.get_tpu_info().vmem_capacity_bytes)
    except Exception:
        vmem_cap = None
    if vmem_cap is not None and vmem_cap > 96 * 1024 * 1024:
        # v5e / v6e class (128 MiB VMEM): big tiles, high scoped limit.
        return 512, 1024, 100 * 1024 * 1024
    # v7x class (64 MiB VMEM per TensorCore) or unknown: conservative.
    return 256, 512, 48 * 1024 * 1024


# ---------------------------------------------------------------------------
# Kernel 1: edge stage   y = lin_rbf(rbf) * x   (single pass over sorted edges)
# ---------------------------------------------------------------------------
def _edge_stage_kernel(x_ref, rbf_ref, w_rbf_ref, y_ref):
    y = jnp.dot(rbf_ref[...].astype(w_rbf_ref.dtype), w_rbf_ref[...],
                preferred_element_type=jnp.float32) * x_ref[...]
    y_ref[...] = y.astype(y_ref.dtype)


# ---------------------------------------------------------------------------
# Kernel 2: segment-sum scatter (tiled one-hot matmul) + node-stage MLP
# ---------------------------------------------------------------------------
def _scatter_mlp_kernel(num_layers, extract_rep, compute_dtype,
                        work_node_ref, work_edge_ref,  # SMEM prefetch [W] i32
                        idx_ref,      # [1, te]   int32 sorted destination ids
                        y_ref,        # [te, hidden]              compute_dtype
                        w_up_ref,     # [hidden, out_emb_p]       compute_dtype
                        b_up_ref,     # [1, out_emb_p]            f32
                        w_lins_ref,   # [L, out_emb_p, out_emb_p] compute_dtype
                        b_lins_ref,   # [L, 1, out_emb_p]         f32
                        w_out_ref,    # [out_emb_p, out_ch_p]     compute_dtype
                        out_ref,      # [tn, out_cols]            f32
                        acc_ref):     # scratch [tn, hidden]      f32
    w = pl.program_id(0)
    n_work = pl.num_programs(0)
    nt = work_node_ref[w]
    prev_nt = work_node_ref[jnp.maximum(w - 1, 0)]
    next_nt = work_node_ref[jnp.minimum(w + 1, n_work - 1)]
    is_first = jnp.logical_or(w == 0, nt != prev_nt)
    is_last = jnp.logical_or(w == n_work - 1, nt != next_nt)

    @pl.when(is_first)
    def _():
        acc_ref[...] = jnp.zeros_like(acc_ref)

    # One-hot scatter of this edge tile into this node tile: a single
    # (tn, te) compare pass ((tn,1) iota vs (1,te) shifted ids), then MXU.
    tn = acc_ref.shape[0]
    local = jax.lax.broadcasted_iota(jnp.int32, (tn, 1), 0)
    rel = idx_ref[...] - nt * tn                    # (1, te), cheap
    onehot = (local == rel).astype(compute_dtype)   # exact in bf16
    # TODO(synk): for hidden < 256 on v6e/v7x, accumulate the transposed form
    # acc_T[hidden, tn] (lanes = tn) to fill the 256-wide MXU columns.
    acc_ref[...] += jnp.dot(onehot, y_ref[...],
                            preferred_element_type=jnp.float32)

    # Node-stage MLP: once per node tile, at its last work item.
    @pl.when(is_last)
    def _():
        h = jnp.dot(acc_ref[...].astype(compute_dtype), w_up_ref[...],
                    preferred_element_type=jnp.float32) + b_up_ref[...]
        for l in range(num_layers):                  # static unroll
            z = jnp.dot(h.astype(compute_dtype), w_lins_ref[l],
                        preferred_element_type=jnp.float32) + b_lins_ref[l]
            h = z * jax.nn.sigmoid(z)                # swish
        if extract_rep:
            out_ref[...] = h.astype(out_ref.dtype)
        else:
            out_ref[...] = jnp.dot(
                h.astype(compute_dtype), w_out_ref[...],
                preferred_element_type=jnp.float32).astype(out_ref.dtype)


# ---------------------------------------------------------------------------
# Wrapper
# ---------------------------------------------------------------------------
def output_pp_block(x, rbf, i, params, num_nodes, *,
                    extract_representation=False,
                    compute_dtype=jnp.bfloat16,
                    node_tile=None, edge_tile=None, vmem_limit_bytes=None):
    """JAX wrapper mirroring OutputPPBlock.forward.

    Edge indices outside [0, num_nodes) are silently dropped (same behaviour
    as segment_sum with a fixed number of segments).  With
    compute_dtype=bfloat16 the per-edge tensor y is rounded to bf16 before
    the (f32-accumulated) scatter; pass compute_dtype=float32 for strict
    parity with the f32 PyTorch module.
    """
    E, hidden = x.shape
    num_radial = rbf.shape[1]
    w_rbf, w_up, b_up, w_lins, b_lins, w_out = params
    num_layers, out_emb, _ = w_lins.shape
    out_channels = w_out.shape[1]

    auto_tn, auto_te, auto_vmem = _auto_config()
    node_tile = auto_tn if node_tile is None else node_tile
    edge_tile = auto_te if edge_tile is None else edge_tile
    vmem_limit_bytes = auto_vmem if vmem_limit_bytes is None else vmem_limit_bytes

    # Tile sizes (sublane/lane aligned, clamped for tiny problems).
    tn = _round_up(min(node_tile, _round_up(num_nodes, 8)), 8)
    te = _round_up(min(edge_tile, _round_up(E, 128)), 128)
    n_pad = _round_up(num_nodes, tn)
    n_tiles = n_pad // tn
    e_pad = _round_up(E, te)
    e_tiles = e_pad // te
    e_total = e_pad + te            # + one all-padding ("dead") edge tile
    dead_tile = e_tiles

    # Lane-pad out_emb / out_channels to multiples of 128 so every output
    # store (logits and representation) is unmasked; zero padding is exact
    # (padded activations stay 0 through the whole MLP).
    out_emb_p = _round_up(out_emb, 128)
    out_ch_p = _round_up(out_channels, 128)
    out_cols = out_emb_p if extract_representation else out_ch_p

    # ---- weights: pre-cast to compute_dtype, zero-pad, done once ----------
    w_rbf_c = w_rbf.astype(compute_dtype)
    w_up_c = jnp.zeros((hidden, out_emb_p), compute_dtype)
    w_up_c = w_up_c.at[:, :out_emb].set(w_up.astype(compute_dtype))
    b_up_c = jnp.zeros((1, out_emb_p), jnp.float32)
    b_up_c = b_up_c.at[:, :out_emb].set(
        b_up.reshape(1, out_emb).astype(jnp.float32))
    w_lins_c = jnp.zeros((num_layers, out_emb_p, out_emb_p), compute_dtype)
    w_lins_c = w_lins_c.at[:, :out_emb, :out_emb].set(
        w_lins.astype(compute_dtype))
    b_lins_c = jnp.zeros((num_layers, 1, out_emb_p), jnp.float32)
    b_lins_c = b_lins_c.at[:, :, :out_emb].set(
        b_lins.reshape(num_layers, 1, out_emb).astype(jnp.float32))
    w_out_c = jnp.zeros((out_emb_p, out_ch_p), compute_dtype)
    w_out_c = w_out_c.at[:out_emb, :out_channels].set(
        w_out.astype(compute_dtype))

    # ---- pad edges and sort them by destination node -----------------------
    sentinel = n_pad                                   # never matches a row id
    idx_in = i.astype(jnp.int32)
    idx_in = jnp.where((idx_in >= 0) & (idx_in < num_nodes), idx_in, sentinel)
    idx_p = jnp.full((e_total,), sentinel, jnp.int32).at[:E].set(idx_in)
    x_p = jnp.zeros((e_total, hidden), x.dtype).at[:E].set(x)
    rbf_p = jnp.zeros((e_total, num_radial), rbf.dtype).at[:E].set(rbf)

    order = jnp.argsort(idx_p)          # padding / dropped edges sort to end
    idx_s = idx_p[order]
    x_s = x_p[order]
    rbf_s = rbf_p[order]

    # ---- static-size work list of (node_tile, edge_tile) pairs -------------
    bounds = jnp.searchsorted(
        idx_s, jnp.arange(n_tiles + 1, dtype=jnp.int32) * tn).astype(jnp.int32)
    starts, ends = bounds[:-1], bounds[1:]
    nonempty = ends > starts
    first_et = starts // te
    count = jnp.where(nonempty, (ends + te - 1) // te - first_et, 1)
    csum = jnp.concatenate(
        [jnp.zeros((1,), jnp.int32), jnp.cumsum(count).astype(jnp.int32)])
    total = csum[-1]

    n_work = e_tiles + n_tiles                          # static upper bound
    w_ids = jnp.arange(n_work, dtype=jnp.int32)
    node_of_w = jnp.clip(jnp.searchsorted(csum, w_ids, side="right") - 1,
                         0, n_tiles - 1).astype(jnp.int32)
    edge_of_w = jnp.where(nonempty[node_of_w],
                          first_et[node_of_w] + (w_ids - csum[node_of_w]),
                          dead_tile)
    is_pad_w = w_ids >= total
    node_of_w = jnp.where(is_pad_w, n_tiles - 1, node_of_w).astype(jnp.int32)
    edge_of_w = jnp.where(is_pad_w, dead_tile, edge_of_w).astype(jnp.int32)

    idx_s2d = idx_s.reshape(1, e_total)

    def run(single_buffer_weights):
        buffered = getattr(pl, "Buffered", None) if single_buffer_weights else None

        def weight_spec(shape):
            index_map = lambda *args, _nd=len(shape): (0,) * _nd
            if buffered is not None:
                return pl.BlockSpec(shape, index_map, pipeline_mode=buffered(1))
            return pl.BlockSpec(shape, index_map)

        # -- edge-stage kernel: y = lin_rbf(rbf) * x, one pass over edges ----
        y_s = pl.pallas_call(
            _edge_stage_kernel,
            out_shape=jax.ShapeDtypeStruct((e_total, hidden), compute_dtype),
            grid_spec=pltpu.PrefetchScalarGridSpec(
                num_scalar_prefetch=0,
                grid=(e_total // te,),
                in_specs=[
                    pl.BlockSpec((te, hidden), lambda t: (t, 0)),
                    pl.BlockSpec((te, num_radial), lambda t: (t, 0)),
                    weight_spec((num_radial, hidden)),
                ],
                out_specs=pl.BlockSpec((te, hidden), lambda t: (t, 0)),
            ),
            compiler_params=pltpu.CompilerParams(
                dimension_semantics=("parallel",),
                vmem_limit_bytes=vmem_limit_bytes),
        )(x_s, rbf_s, w_rbf_c)

        # -- scatter + MLP kernel over the prefetched work list --------------
        kernel = functools.partial(_scatter_mlp_kernel, num_layers,
                                   extract_representation, compute_dtype)
        return pl.pallas_call(
            kernel,
            out_shape=jax.ShapeDtypeStruct((n_pad, out_cols), jnp.float32),
            grid_spec=pltpu.PrefetchScalarGridSpec(
                num_scalar_prefetch=2,
                grid=(n_work,),
                in_specs=[
                    pl.BlockSpec((1, te), lambda w, wn, we: (0, we[w])),
                    pl.BlockSpec((te, hidden), lambda w, wn, we: (we[w], 0)),
                    weight_spec((hidden, out_emb_p)),
                    weight_spec((1, out_emb_p)),
                    weight_spec((num_layers, out_emb_p, out_emb_p)),
                    weight_spec((num_layers, 1, out_emb_p)),
                    weight_spec((out_emb_p, out_ch_p)),
                ],
                out_specs=pl.BlockSpec((tn, out_cols),
                                       lambda w, wn, we: (wn[w], 0)),
                scratch_shapes=[pltpu.VMEM((tn, hidden), jnp.float32)],
            ),
            compiler_params=pltpu.CompilerParams(
                # TODO(synk): on v7x (2 TCs) split node tiles across cores via
                # core_map; the flattened work-list axis must stay arbitrary.
                dimension_semantics=("arbitrary",),
                vmem_limit_bytes=vmem_limit_bytes),
        )(node_of_w, edge_of_w, idx_s2d, y_s,
          w_up_c, b_up_c, w_lins_c, b_lins_c, w_out_c)

    try:
        result = run(single_buffer_weights=True)
    except Exception:
        # Fallback if pipeline_mode=pl.Buffered(1) is unsupported here.
        result = run(single_buffer_weights=False)

    if extract_representation:
        return result[:num_nodes, :out_emb]
    return result[:num_nodes, :out_channels]


# ---------------------------------------------------------------------------
# Parameters / reference / test
# ---------------------------------------------------------------------------
def init_params(key, num_radial, hidden_channels, out_emb_channels,
                out_channels, num_layers, zero_final=True, random_bias=False):
    """Synthetic init matching the module's parameter shapes (forward only).

    glorot_orthogonal approximated by scaled gaussians (init-time detail,
    does not affect forward-pass semantics)."""
    k = jax.random.split(key, 6)

    def glorot(k_, fan_in, fan_out):
        scale = (2.0 / (fan_in + fan_out)) ** 0.5
        return scale * jax.random.normal(k_, (fan_in, fan_out), jnp.float32)

    w_rbf = glorot(k[0], num_radial, hidden_channels)
    w_up = glorot(k[1], hidden_channels, out_emb_channels)
    lin_keys = jax.random.split(k[2], num_layers)
    w_lins = jnp.stack(
        [glorot(lk, out_emb_channels, out_emb_channels) for lk in lin_keys])
    if random_bias:
        b_up = 0.1 * jax.random.normal(k[3], (1, out_emb_channels), jnp.float32)
        b_lins = 0.1 * jax.random.normal(
            k[4], (num_layers, 1, out_emb_channels), jnp.float32)
    else:
        b_up = jnp.zeros((1, out_emb_channels), jnp.float32)
        b_lins = jnp.zeros((num_layers, 1, out_emb_channels), jnp.float32)
    if zero_final:
        w_out = jnp.zeros((out_emb_channels, out_channels), jnp.float32)
    else:
        w_out = glorot(k[5], out_emb_channels, out_channels)
    return (w_rbf, w_up, b_up, w_lins, b_lins, w_out)


def _reference(x, rbf, i, params, num_nodes):
    w_rbf, w_up, b_up, w_lins, b_lins, w_out = params
    y = (rbf @ w_rbf) * x
    s = jax.ops.segment_sum(y, i, num_segments=num_nodes)
    h = s @ w_up + b_up
    for l in range(w_lins.shape[0]):
        z = h @ w_lins[l] + b_lins[l]
        h = z * jax.nn.sigmoid(z)
    return h, h @ w_out


def _rel_err(a, b):
    return float(jnp.linalg.norm(a - b) / (jnp.linalg.norm(b) + 1e-12))


if __name__ == "__main__":
    key = jax.random.PRNGKey(0)

    # Small shapes consistent with a DimeNet++ output block.
    num_radial = 6
    hidden_channels = 32
    out_emb_channels = 64
    out_channels = 12
    num_layers = 3
    num_edges = 300
    num_nodes = 40          # nodes 30..39 receive no edges (isolated-node path)

    k_x, k_rbf, k_i, k_p = jax.random.split(key, 4)
    x = jax.random.normal(k_x, (num_edges, hidden_channels), jnp.float32)
    rbf = jax.random.normal(k_rbf, (num_edges, num_radial), jnp.float32)
    i = jax.random.randint(k_i, (num_edges,), 0, 30, jnp.int32)

    # Non-zero final weight and non-zero biases so every stage is validated
    # (reset_parameters zeroes them, which would hide bugs).
    params = init_params(k_p, num_radial, hidden_channels, out_emb_channels,
                         out_channels, num_layers,
                         zero_final=False, random_bias=True)

    ref_rep, ref_out = _reference(x, rbf, i, params, num_nodes)

    # f32 MXU operands: small tiles exercise multiple node/edge tiles, tile
    # straddling in the sorted work list, empty node tiles, and dead-tile pad.
    out_f32 = output_pp_block(x, rbf, i, params, num_nodes,
                              extract_representation=False,
                              compute_dtype=jnp.float32,
                              node_tile=16, edge_tile=128)
    rep_f32 = output_pp_block(x, rbf, i, params, num_nodes,
                              extract_representation=True,
                              compute_dtype=jnp.float32,
                              node_tile=16, edge_tile=128)
    jax.block_until_ready((out_f32, rep_f32))
    assert out_f32.shape == (num_nodes, out_channels)
    assert rep_f32.shape == (num_nodes, out_emb_channels)
    assert _rel_err(out_f32, ref_out) < 2e-2, _rel_err(out_f32, ref_out)
    assert _rel_err(rep_f32, ref_rep) < 2e-2, _rel_err(rep_f32, ref_rep)

    # bf16 MXU operands (fast path), f32 accumulation.
    out_bf16 = output_pp_block(x, rbf, i, params, num_nodes,
                               extract_representation=False,
                               compute_dtype=jnp.bfloat16,
                               node_tile=16, edge_tile=128)
    jax.block_until_ready(out_bf16)
    assert _rel_err(out_bf16, ref_out) < 6e-2, _rel_err(out_bf16, ref_out)

    # Auto (generation-conditional) tiles.
    out_auto = output_pp_block(x, rbf, i, params, num_nodes,
                               extract_representation=False,
                               compute_dtype=jnp.float32)
    jax.block_until_ready(out_auto)
    assert _rel_err(out_auto, ref_out) < 2e-2, _rel_err(out_auto, ref_out)

    print("KERNEL_OK")
</pallas_src>

<mosaic_0001>
module attributes {stable_mosaic.version = 11 : i64} {
  func.func @_edge_stage_kernel(%arg0: i32, %arg1: memref<128x32xf32, #tpu.memory_space<vmem>>, %arg2: memref<128x6xf32, #tpu.memory_space<vmem>>, %arg3: memref<6x32xf32, #tpu.memory_space<vmem>>, %arg4: memref<128x32xf32, #tpu.memory_space<vmem>>) attributes {dimension_semantics = [#tpu.dimension_semantics<parallel>], iteration_bounds = array<i64: 4>, scalar_prefetch = 0 : i64, scratch_operands = 0 : i64, tpu.core_type = #tpu.core_type<tc>, window_params = [{transform_indices = @transform_0, window_bounds = array<i64: 128, 32>}, {transform_indices = @transform_1, window_bounds = array<i64: 128, 6>}, {pipeline_mode = #tpu.pipeline_mode<synchronous>, transform_indices = @transform_2, window_bounds = array<i64: 6, 32>}, {transform_indices = @transform_3, window_bounds = array<i64: 128, 32>}]} {
    %c0 = arith.constant 0 : index
    %c0_0 = arith.constant 0 : index
    %0 = vector.load %arg2[%c0, %c0_0] : memref<128x6xf32, #tpu.memory_space<vmem>>, vector<128x6xf32>
    %c0_1 = arith.constant 0 : index
    %c0_2 = arith.constant 0 : index
    %1 = vector.load %arg3[%c0_1, %c0_2] : memref<6x32xf32, #tpu.memory_space<vmem>>, vector<6x32xf32>
    %cst = arith.constant dense<0.000000e+00> : vector<128x32xf32>
    %2 = tpu.matmul %0, %1, %cst {dimension_numbers = #tpu.dot_dimension_numbers<[1], [0], [0], [1], [0, 0, 1, 1], [], []>} : vector<128x6xf32>, vector<6x32xf32>, vector<128x32xf32> -> vector<128x32xf32>
    %c0_3 = arith.constant 0 : index
    %c0_4 = arith.constant 0 : index
    %3 = vector.load %arg1[%c0_3, %c0_4] : memref<128x32xf32, #tpu.memory_space<vmem>>, vector<128x32xf32>
    %4 = arith.mulf %2, %3 : vector<128x32xf32>
    %c0_5 = arith.constant 0 : index
    %c0_6 = arith.constant 0 : index
    %5 = vector.load %arg4[%c0_5, %c0_6] : memref<128x32xf32, #tpu.memory_space<vmem>>, vector<128x32xf32>
    tpu.vector_store %arg4[%c0_5, %c0_6], %4 {strides = array<i32>} : memref<128x32xf32, #tpu.memory_space<vmem>>, vector<128x32xf32>,
    return
  }
  func.func @transform_0(%arg0: i32) -> (i32, i32) {
    %c0_i32 = arith.constant 0 : i32
    %c0_i32_0 = arith.constant 0 : i32
    return %arg0, %c0_i32 : i32, i32
  }
  func.func @transform_1(%arg0: i32) -> (i32, i32) {
    %c0_i32 = arith.constant 0 : i32
    %c0_i32_0 = arith.constant 0 : i32
    return %arg0, %c0_i32 : i32, i32
  }
  func.func @transform_2(%arg0: i32) -> (i32, i32) {
    %c0_i32 = arith.constant 0 : i32
    %c0_i32_0 = arith.constant 0 : i32
    %c0_i32_1 = arith.constant 0 : i32
    return %c0_i32, %c0_i32_0 : i32, i32
  }
  func.func @transform_3(%arg0: i32) -> (i32, i32) {
    %c0_i32 = arith.constant 0 : i32
    %c0_i32_0 = arith.constant 0 : i32
    return %arg0, %c0_i32 : i32, i32
  }
}

module attributes {stable_mosaic.version = 11 : i64} {
  func.func @_edge_stage_kernel(%arg0: i32, %arg1: memref<128x32xf32, #tpu.memory_space<vmem>>, %arg2: memref<128x6xf32, #tpu.memory_space<vmem>>, %arg3: memref<6x32xf32, #tpu.memory_space<vmem>>, %arg4: memref<128x32xf32, #tpu.memory_space<vmem>>) attributes {dimension_semantics = [#tpu.dimension_semantics<parallel>], iteration_bounds = array<i64: 4>, scalar_prefetch = 0 : i64, scratch_operands = 0 : i64, tpu.core_type = #tpu.core_type<tc>, window_params = [{transform_indices = @transform_0, window_bounds = array<i64: 128, 32>}, {transform_indices = @transform_1, window_bounds = array<i64: 128, 6>}, {pipeline_mode = #tpu.pipeline_mode<synchronous>, transform_indices = @transform_2, window_bounds = array<i64: 6, 32>}, {transform_indices = @transform_3, window_bounds = array<i64: 128, 32>}]} {
    %c0 = arith.constant 0 : index
    %c0_0 = arith.constant 0 : index
    %0 = vector.load %arg2[%c0, %c0_0] : memref<128x6xf32, #tpu.memory_space<vmem>>, vector<128x6xf32>
    %c0_1 = arith.constant 0 : index
    %c0_2 = arith.constant 0 : index
    %1 = vector.load %arg3[%c0_1, %c0_2] : memref<6x32xf32, #tpu.memory_space<vmem>>, vector<6x32xf32>
    %cst = arith.constant dense<0.000000e+00> : vector<128x32xf32>
    %2 = tpu.matmul %0, %1, %cst {dimension_numbers = #tpu.dot_dimension_numbers<[1], [0], [0], [1], [0, 0, 1, 1], [], []>} : vector<128x6xf32>, vector<6x32xf32>, vector<128x32xf32> -> vector<128x32xf32>
    %c0_3 = arith.constant 0 : index
    %c0_4 = arith.constant 0 : index
    %3 = vector.load %arg1[%c0_3, %c0_4] : memref<128x32xf32, #tpu.memory_space<vmem>>, vector<128x32xf32>
    %4 = arith.mulf %2, %3 : vector<128x32xf32>
    %c0_5 = arith.constant 0 : index
    %c0_6 = arith.constant 0 : index
    %5 = vector.load %arg4[%c0_5, %c0_6] : memref<128x32xf32, #tpu.memory_space<vmem>>, vector<128x32xf32>
    tpu.vector_store %arg4[%c0_5, %c0_6], %4 {strides = array<i32>} : memref<128x32xf32, #tpu.memory_space<vmem>>, vector<128x32xf32>,
    return
  }
  func.func @transform_0(%arg0: i32) -> (i32, i32) {
    %c0_i32 = arith.constant 0 : i32
    %c0_i32_0 = arith.constant 0 : i32
    return %arg0, %c0_i32 : i32, i32
  }
  func.func @transform_1(%arg0: i32) -> (i32, i32) {
    %c0_i32 = arith.constant 0 : i32
    %c0_i32_0 = arith.constant 0 : i32
    return %arg0, %c0_i32 : i32, i32
  }
  func.func @transform_2(%arg0: i32) -> (i32, i32) {
    %c0_i32 = arith.constant 0 : i32
    %c0_i32_0 = arith.constant 0 : i32
    %c0_i32_1 = arith.constant 0 : i32
    return %c0_i32, %c0_i32_0 : i32, i32
  }
  func.func @transform_3(%arg0: i32) -> (i32, i32) {
    %c0_i32 = arith.constant 0 : i32
    %c0_i32_0 = arith.constant 0 : i32
    return %arg0, %c0_i32 : i32, i32
  }
}

</mosaic_0001>

<bundles_post_ra>
// kernel: tpu_custom_call.1
= control target key start
LH: loop header
LB: loop body
LE: loop exit
PB: predicated region body
PF: predicated region fallthrough
CT: control target
= control target key end

     0   :  { %s639_s12 = smov 0   ;;  %s735_s0 = inlined_call_operand.vmem [shape: f32[512,32], index: 0, kind: input, shape index: {}]   ;;  %s736_s1 = inlined_call_operand.vmem [shape: f32[512,6], index: 1, kind: input, shape index: {}]   ;;  %s737_s2 = inlined_call_operand.vmem [shape: f32[6,32], index: 2, kind: input, shape index: {}]   ;;  %s738_s3 = inlined_call_operand.vmem [shape: f32[512,32], index: 3, kind: output, shape index: {}]  }
   0x1 LB: > { %s528_s13 = sadd.s32 4294967295, %s617_s12   ;;  %p532_p0 = scmp.ge.s32.totalorder %s617_s12, 1  ;;  %s617_s12 = sphi %s639_s12, %s13_s12  }
   0x2   : > { %p149_p1 = scmp.lt.s32.totalorder %s617_s12, 5 }
   0x4   : > { %p150_p2 = pnand %p532_p0, %p149_p1 }
   0x5   : > { %v212_v0 = vld [vmem:[%s737_s2] sm:$0x3f] (!%p150_p2)  ;;  %vm262_vm0 = vcmask (!%p150_p2), 1045504   ;;  %s533_s16 = sshll.u32 (!%p150_p2), %s528_s13, 4  ;;  %vm213_vm1 = vcmask (!%p150_p2), 48128   ;;  %vm443_vm2 = vcmask (!%p150_p2), 261120  }
   0x6   : > { %153 = sbr.rel (%p150_p2) target bundleno = 247 (0xf7), region = 32  ;;  %575 = vmatprep.subr.msk.mxu0 (!%p150_p2), %vm262_vm0, %v212_v0  ;;  %601 = vmatprep.subr.msk.mxu1 (!%p150_p2), %vm262_vm0, %v212_v0  ;;  %p179_p3 = scmp.lt.s32.totalorder (!%p150_p2), %s533_s16, 63 }
   0x7   : > { %576 = vmatpush3.msk.msra.mxu0 (!%p150_p2), %vm262_vm0, %v212_v0  ;;  %602 = vmatpush3.msk.msra.mxu1 (!%p150_p2), %vm262_vm0, %v212_v0 }
   0xd   : > { %s740_s16 = smov (!%p179_p3, %s533_s16), 63 }
   0xe   : > { %s650_s17 = sshll.u32 %s740_s16, 3 }
   0xf   : > { %s188_s20 = scalar_lea.vmem %s736_s1, %s650_s17  ;;  %s676_s23 = scalar_lea.vmem %s735_s0, %s650_s17 }
  0x10   : > { %v196_v1 = vld [vmem:[%s188_s20] sm:$0xff]  ;;  %v197_v3 = vld [vmem:[%s188_s20 + $0x8] sm:$0xff]  ;;  %v198_v5 = vld [vmem:[%s188_s20 + $0x10] sm:$0xff]  ;;  %s686_s26 = scalar_lea.vmem %s738_s3, %s650_s17 }
  0x11   : > { %v204_v2 = vld [vmem:[%s188_s20 + $0x40] sm:$0xff]  ;;  %577 = vmatprep.mubr.msk.f32.mxu0 %vm213_vm1, %v196_v1  ;;  %v205_v4 = vld [vmem:[%s188_s20 + $0x48] sm:$0xff]  ;;  %v206_v6 = vld [vmem:[%s188_s20 + $0x50] sm:$0xff] }
  0x12   : > { %589 = vmatprep.mubr.msk.f32.mxu1 %vm213_vm1, %v204_v2  ;;  %578 = vmatmul.mubr.msk.f32.vlgmr.msra.gmra.mrb[0].mxu0 %vm213_vm1, %v197_v3  ;;  %v199_v7 = vld [vmem:[%s188_s20 + $0x18] sm:$0xff]  ;;  %v200_v9 = vld [vmem:[%s188_s20 + $0x20] sm:$0xff]  ;;  %v201_v11 = vld [vmem:[%s188_s20 + $0x28] sm:$0xff] }
  0x13   : > { %590 = vmatmul.mubr.msk.f32.vlgmr.msra.gmra.mrb[0].mxu1 %vm213_vm1, %v205_v4  ;;  %580 = vmatprep.mubr.msk.f32.mxu0 %vm213_vm1, %v198_v5  ;;  %v207_v8 = vld [vmem:[%s188_s20 + $0x58] sm:$0xff]  ;;  %v208_v10 = vld [vmem:[%s188_s20 + $0x60] sm:$0xff]  ;;  %v209_v12 = vld [vmem:[%s188_s20 + $0x68] sm:$0xff] }
  0x14   : > { %592 = vmatprep.mubr.msk.f32.mxu1 %vm213_vm1, %v206_v6  ;;  %v202_v13 = vld [vmem:[%s188_s20 + $0x30] sm:$0xff]  ;;  %v203_v15 = vld [vmem:[%s188_s20 + $0x38] sm:$0xff]  ;;  %v412_v17 = vld [vmem:[%s676_s23 + $0x8] sm:$0xff] }
  0x15   : > { %v210_v14 = vld [vmem:[%s188_s20 + $0x70] sm:$0xff]  ;;  %v211_v16 = vld [vmem:[%s188_s20 + $0x78] sm:$0xff]  ;;  %v420_v18 = vld [vmem:[%s676_s23 + $0x48] sm:$0xff] }
  0x16   : > { %581 = vmatmul.mubr.msk.f32.gmra.mrb[2].mxu0 %vm213_vm1, %v199_v7  ;;  %v411_v19 = vld [vmem:[%s676_s23] sm:$0xff]  ;;  %v414_v29 = vld [vmem:[%s676_s23 + $0x18] sm:$0xff]  ;;  %v413_v31 = vld [vmem:[%s676_s23 + $0x10] sm:$0xff] }
  0x17   : > { %593 = vmatmul.mubr.msk.f32.gmra.mrb[2].mxu1 %vm213_vm1, %v207_v8  ;;  %583 = vmatprep.mubr.msk.f32.mxu0 %vm213_vm1, %v200_v9  ;;  %v419_v20 = vld [vmem:[%s676_s23 + $0x40] sm:$0xff]  ;;  %v422_v30 = vld [vmem:[%s676_s23 + $0x58] sm:$0xff]  ;;  %v421_v32 = vld [vmem:[%s676_s23 + $0x50] sm:$0xff] }
  0x18   : > { %595 = vmatprep.mubr.msk.f32.mxu1 %vm213_vm1, %v208_v10  ;;  %v416_v41 = vld [vmem:[%s676_s23 + $0x28] sm:$0xff]  ;;  %v415_v43 = vld [vmem:[%s676_s23 + $0x20] sm:$0xff]  ;;  %v418_v53 = vld [vmem:[%s676_s23 + $0x38] sm:$0xff] }
  0x19   : > { %v424_v42 = vld [vmem:[%s676_s23 + $0x68] sm:$0xff]  ;;  %v423_v44 = vld [vmem:[%s676_s23 + $0x60] sm:$0xff]  ;;  %v426_v54 = vld [vmem:[%s676_s23 + $0x78] sm:$0xff] }
  0x1a   : > { %584 = vmatmul.mubr.msk.f32.gmra.mrb[4].mxu0 %vm213_vm1, %v201_v11  ;;  %v417_v55 = vld [vmem:[%s676_s23 + $0x30] sm:$0xff] }
  0x1b   : > { %596 = vmatmul.mubr.msk.f32.gmra.mrb[4].mxu1 %vm213_vm1, %v209_v12  ;;  %586 = vmatprep.mubr.msk.f32.mxu0 %vm213_vm1, %v202_v13  ;;  %v425_v56 = vld [vmem:[%s676_s23 + $0x70] sm:$0xff] }
  0x1c   : > { %598 = vmatprep.mubr.msk.f32.mxu1 %vm213_vm1, %v210_v14 }
  0x1e   : > { %587 = vmatmul.mubr.msk.f32.gmra.mrb[6].mxu0 %vm213_vm1, %v203_v15 }
  0x1f   : > { %599 = vmatmul.mubr.msk.f32.gmra.mrb[6].mxu1 %vm213_vm1, %v211_v16 }
  0xe5   : > { %v579_v21 = vpop.f32.mrb[0].mxu0 }
  0xe6   : > { %v591_v22 = vpop.f32.mrb[0].mxu1  ;;  %v428_v23 = vmul.f32 %v579_v21, %v412_v17  ;;  %v332_v25 = vpop.f32.mrb[1].mxu0 }
  0xe7   : > { %v436_v24 = vmul.f32 %v591_v22, %v420_v18  ;;  %v372_v26 = vpop.f32.mrb[1].mxu1  ;;  %v427_v27 = vmul.f32 %v411_v19, %v332_v25 }
  0xe8   : > { %v435_v28 = vmul.f32 %v419_v20, %v372_v26  ;;  %445 = vst.msk [vmem:[%s686_s26 + $0x8] sm:$0xff] %vm443_vm2, %v428_v23 }
  0xe9   : > { %453 = vst.msk [vmem:[%s686_s26 + $0x48] sm:$0xff] %vm443_vm2, %v436_v24  ;;  %444 = vst.msk [vmem:[%s686_s26] sm:$0xff] %vm443_vm2, %v427_v27  ;;  %v582_v33 = vpop.f32.mrb[2].mxu0 }
  0xea   : > { %452 = vst.msk [vmem:[%s686_s26 + $0x40] sm:$0xff] %vm443_vm2, %v435_v28  ;;  %v594_v34 = vpop.f32.mrb[2].mxu1  ;;  %v430_v35 = vmul.f32 %v582_v33, %v414_v29  ;;  %v342_v37 = vpop.f32.mrb[3].mxu0 }
  0xeb   : > { %v438_v36 = vmul.f32 %v594_v34, %v422_v30  ;;  %v382_v38 = vpop.f32.mrb[3].mxu1  ;;  %v429_v39 = vmul.f32 %v413_v31, %v342_v37 }
  0xec   : > { %v437_v40 = vmul.f32 %v421_v32, %v382_v38  ;;  %447 = vst.msk [vmem:[%s686_s26 + $0x18] sm:$0xff] %vm443_vm2, %v430_v35 }
  0xed   : > { %455 = vst.msk [vmem:[%s686_s26 + $0x58] sm:$0xff] %vm443_vm2, %v438_v36  ;;  %446 = vst.msk [vmem:[%s686_s26 + $0x10] sm:$0xff] %vm443_vm2, %v429_v39  ;;  %v585_v45 = vpop.f32.mrb[4].mxu0 }
  0xee   : > { %454 = vst.msk [vmem:[%s686_s26 + $0x50] sm:$0xff] %vm443_vm2, %v437_v40  ;;  %v597_v46 = vpop.f32.mrb[4].mxu1  ;;  %v432_v47 = vmul.f32 %v585_v45, %v416_v41  ;;  %v352_v49 = vpop.f32.mrb[5].mxu0 }
  0xef   : > { %v440_v48 = vmul.f32 %v597_v46, %v424_v42  ;;  %v392_v50 = vpop.f32.mrb[5].mxu1  ;;  %v431_v51 = vmul.f32 %v415_v43, %v352_v49 }
  0xf0   : > { %v439_v52 = vmul.f32 %v423_v44, %v392_v50  ;;  %449 = vst.msk [vmem:[%s686_s26 + $0x28] sm:$0xff] %vm443_vm2, %v432_v47 }
  0xf1   : > { %457 = vst.msk [vmem:[%s686_s26 + $0x68] sm:$0xff] %vm443_vm2, %v440_v48  ;;  %448 = vst.msk [vmem:[%s686_s26 + $0x20] sm:$0xff] %vm443_vm2, %v431_v51  ;;  %v588_v57 = vpop.f32.mrb[6].mxu0 }
  0xf2   : > { %456 = vst.msk [vmem:[%s686_s26 + $0x60] sm:$0xff] %vm443_vm2, %v439_v52  ;;  %v600_v58 = vpop.f32.mrb[6].mxu1  ;;  %v434_v59 = vmul.f32 %v588_v57, %v418_v53  ;;  %v362_v61 = vpop.f32.mrb[7].mxu0 }
  0xf3   : > { %v442_v60 = vmul.f32 %v600_v58, %v426_v54  ;;  %v402_v62 = vpop.f32.mrb[7].mxu1  ;;  %v433_v63 = vmul.f32 %v417_v55, %v362_v61 }
  0xf4   : > { %v441_v0 = vmul.f32 %v425_v56, %v402_v62  ;;  %451 = vst.msk [vmem:[%s686_s26 + $0x38] sm:$0xff] %vm443_vm2, %v434_v59 }
  0xf5   : > { %459 = vst.msk [vmem:[%s686_s26 + $0x78] sm:$0xff] %vm443_vm2, %v442_v60  ;;  %450 = vst.msk [vmem:[%s686_s26 + $0x30] sm:$0xff] %vm443_vm2, %v433_v63 }
  0xf6   : > { %458 = vst.msk [vmem:[%s686_s26 + $0x70] sm:$0xff] %vm443_vm2, %v441_v0 }
  0xf7 PF: > { %s13_s12 = sadd.s32 1, %s617_s12  }
  0xf8   : > { %p10_p4 = scmp.ge.s32.totalorder %s13_s12, 6  }
  0xfa   :  { %12 = sbr.rel (!%p10_p4) target bundleno = 1 (0x1), region = 65 }

// kernel: tpu_custom_call.1
= control target key start
LH: loop header
LB: loop body
LE: loop exit
PB: predicated region body
PF: predicated region fallthrough
CT: control target
= control target key end

     0   :  { %s639_s12 = smov 0   ;;  %s735_s0 = inlined_call_operand.vmem [shape: f32[512,32], index: 0, kind: input, shape index: {}]   ;;  %s736_s1 = inlined_call_operand.vmem [shape: f32[512,6], index: 1, kind: input, shape index: {}]   ;;  %s737_s2 = inlined_call_operand.vmem [shape: f32[6,32], index: 2, kind: input, shape index: {}]   ;;  %s738_s3 = inlined_call_operand.vmem [shape: f32[512,32], index: 3, kind: output, shape index: {}]  }
   0x1 LB: > { %s528_s13 = sadd.s32 4294967295, %s617_s12   ;;  %p532_p0 = scmp.ge.s32.totalorder %s617_s12, 1  ;;  %s617_s12 = sphi %s639_s12, %s13_s12  }
   0x2   : > { %p149_p1 = scmp.lt.s32.totalorder %s617_s12, 5 }
   0x4   : > { %p150_p2 = pnand %p532_p0, %p149_p1 }
   0x5   : > { %v212_v0 = vld [vmem:[%s737_s2] sm:$0x3f] (!%p150_p2)  ;;  %vm262_vm0 = vcmask (!%p150_p2), 1045504   ;;  %s533_s16 = sshll.u32 (!%p150_p2), %s528_s13, 4  ;;  %vm213_vm1 = vcmask (!%p150_p2), 48128   ;;  %vm443_vm2 = vcmask (!%p150_p2), 261120  }
   0x6   : > { %153 = sbr.rel (%p150_p2) target bundleno = 247 (0xf7), region = 32  ;;  %575 = vmatprep.subr.msk.mxu0 (!%p150_p2), %vm262_vm0, %v212_v0  ;;  %601 = vmatprep.subr.msk.mxu1 (!%p150_p2), %vm262_vm0, %v212_v0  ;;  %p179_p3 = scmp.lt.s32.totalorder (!%p150_p2), %s533_s16, 63 }
   0x7   : > { %576 = vmatpush3.msk.msra.mxu0 (!%p150_p2), %vm262_vm0, %v212_v0  ;;  %602 = vmatpush3.msk.msra.mxu1 (!%p150_p2), %vm262_vm0, %v212_v0 }
   0xd   : > { %s740_s16 = smov (!%p179_p3, %s533_s16), 63 }
   0xe   : > { %s650_s17 = sshll.u32 %s740_s16, 3 }
   0xf   : > { %s188_s20 = scalar_lea.vmem %s736_s1, %s650_s17  ;;  %s676_s23 = scalar_lea.vmem %s735_s0, %s650_s17 }
  0x10   : > { %v196_v1 = vld [vmem:[%s188_s20] sm:$0xff]  ;;  %v197_v3 = vld [vmem:[%s188_s20 + $0x8] sm:$0xff]  ;;  %v198_v5 = vld [vmem:[%s188_s20 + $0x10] sm:$0xff]  ;;  %s686_s26 = scalar_lea.vmem %s738_s3, %s650_s17 }
  0x11   : > { %v204_v2 = vld [vmem:[%s188_s20 + $0x40] sm:$0xff]  ;;  %577 = vmatprep.mubr.msk.f32.mxu0 %vm213_vm1, %v196_v1  ;;  %v205_v4 = vld [vmem:[%s188_s20 + $0x48] sm:$0xff]  ;;  %v206_v6 = vld [vmem:[%s188_s20 + $0x50] sm:$0xff] }
  0x12   : > { %589 = vmatprep.mubr.msk.f32.mxu1 %vm213_vm1, %v204_v2  ;;  %578 = vmatmul.mubr.msk.f32.vlgmr.msra.gmra.mrb[0].mxu0 %vm213_vm1, %v197_v3  ;;  %v199_v7 = vld [vmem:[%s188_s20 + $0x18] sm:$0xff]  ;;  %v200_v9 = vld [vmem:[%s188_s20 + $0x20] sm:$0xff]  ;;  %v201_v11 = vld [vmem:[%s188_s20 + $0x28] sm:$0xff] }
  0x13   : > { %590 = vmatmul.mubr.msk.f32.vlgmr.msra.gmra.mrb[0].mxu1 %vm213_vm1, %v205_v4  ;;  %580 = vmatprep.mubr.msk.f32.mxu0 %vm213_vm1, %v198_v5  ;;  %v207_v8 = vld [vmem:[%s188_s20 + $0x58] sm:$0xff]  ;;  %v208_v10 = vld [vmem:[%s188_s20 + $0x60] sm:$0xff]  ;;  %v209_v12 = vld [vmem:[%s188_s20 + $0x68] sm:$0xff] }
  0x14   : > { %592 = vmatprep.mubr.msk.f32.mxu1 %vm213_vm1, %v206_v6  ;;  %v202_v13 = vld [vmem:[%s188_s20 + $0x30] sm:$0xff]  ;;  %v203_v15 = vld [vmem:[%s188_s20 + $0x38] sm:$0xff]  ;;  %v412_v17 = vld [vmem:[%s676_s23 + $0x8] sm:$0xff] }
  0x15   : > { %v210_v14 = vld [vmem:[%s188_s20 + $0x70] sm:$0xff]  ;;  %v211_v16 = vld [vmem:[%s188_s20 + $0x78] sm:$0xff]  ;;  %v420_v18 = vld [vmem:[%s676_s23 + $0x48] sm:$0xff] }
  0x16   : > { %581 = vmatmul.mubr.msk.f32.gmra.mrb[2].mxu0 %vm213_vm1, %v199_v7  ;;  %v411_v19 = vld [vmem:[%s676_s23] sm:$0xff]  ;;  %v414_v29 = vld [vmem:[%s676_s23 + $0x18] sm:$0xff]  ;;  %v413_v31 = vld [vmem:[%s676_s23 + $0x10] sm:$0xff] }
  0x17   : > { %593 = vmatmul.mubr.msk.f32.gmra.mrb[2].mxu1 %vm213_vm1, %v207_v8  ;;  %583 = vmatprep.mubr.msk.f32.mxu0 %vm213_vm1, %v200_v9  ;;  %v419_v20 = vld [vmem:[%s676_s23 + $0x40] sm:$0xff]  ;;  %v422_v30 = vld [vmem:[%s676_s23 + $0x58] sm:$0xff]  ;;  %v421_v32 = vld [vmem:[%s676_s23 + $0x50] sm:$0xff] }
  0x18   : > { %595 = vmatprep.mubr.msk.f32.mxu1 %vm213_vm1, %v208_v10  ;;  %v416_v41 = vld [vmem:[%s676_s23 + $0x28] sm:$0xff]  ;;  %v415_v43 = vld [vmem:[%s676_s23 + $0x20] sm:$0xff]  ;;  %v418_v53 = vld [vmem:[%s676_s23 + $0x38] sm:$0xff] }
  0x19   : > { %v424_v42 = vld [vmem:[%s676_s23 + $0x68] sm:$0xff]  ;;  %v423_v44 = vld [vmem:[%s676_s23 + $0x60] sm:$0xff]  ;;  %v426_v54 = vld [vmem:[%s676_s23 + $0x78] sm:$0xff] }
  0x1a   : > { %584 = vmatmul.mubr.msk.f32.gmra.mrb[4].mxu0 %vm213_vm1, %v201_v11  ;;  %v417_v55 = vld [vmem:[%s676_s23 + $0x30] sm:$0xff] }
  0x1b   : > { %596 = vmatmul.mubr.msk.f32.gmra.mrb[4].mxu1 %vm213_vm1, %v209_v12  ;;  %586 = vmatprep.mubr.msk.f32.mxu0 %vm213_vm1, %v202_v13  ;;  %v425_v56 = vld [vmem:[%s676_s23 + $0x70] sm:$0xff] }
  0x1c   : > { %598 = vmatprep.mubr.msk.f32.mxu1 %vm213_vm1, %v210_v14 }
  0x1e   : > { %587 = vmatmul.mubr.msk.f32.gmra.mrb[6].mxu0 %vm213_vm1, %v203_v15 }
  0x1f   : > { %599 = vmatmul.mubr.msk.f32.gmra.mrb[6].mxu1 %vm213_vm1, %v211_v16 }
  0xe5   : > { %v579_v21 = vpop.f32.mrb[0].mxu0 }
  0xe6   : > { %v591_v22 = vpop.f32.mrb[0].mxu1  ;;  %v428_v23 = vmul.f32 %v579_v21, %v412_v17  ;;  %v332_v25 = vpop.f32.mrb[1].mxu0 }
  0xe7   : > { %v436_v24 = vmul.f32 %v591_v22, %v420_v18  ;;  %v372_v26 = vpop.f32.mrb[1].mxu1  ;;  %v427_v27 = vmul.f32 %v411_v19, %v332_v25 }
  0xe8   : > { %v435_v28 = vmul.f32 %v419_v20, %v372_v26  ;;  %445 = vst.msk [vmem:[%s686_s26 + $0x8] sm:$0xff] %vm443_vm2, %v428_v23 }
  0xe9   : > { %453 = vst.msk [vmem:[%s686_s26 + $0x48] sm:$0xff] %vm443_vm2, %v436_v24  ;;  %444 = vst.msk [vmem:[%s686_s26] sm:$0xff] %vm443_vm2, %v427_v27  ;;  %v582_v33 = vpop.f32.mrb[2].mxu0 }
  0xea   : > { %452 = vst.msk [vmem:[%s686_s26 + $0x40] sm:$0xff] %vm443_vm2, %v435_v28  ;;  %v594_v34 = vpop.f32.mrb[2].mxu1  ;;  %v430_v35 = vmul.f32 %v582_v33, %v414_v29  ;;  %v342_v37 = vpop.f32.mrb[3].mxu0 }
  0xeb   : > { %v438_v36 = vmul.f32 %v594_v34, %v422_v30  ;;  %v382_v38 = vpop.f32.mrb[3].mxu1  ;;  %v429_v39 = vmul.f32 %v413_v31, %v342_v37 }
  0xec   : > { %v437_v40 = vmul.f32 %v421_v32, %v382_v38  ;;  %447 = vst.msk [vmem:[%s686_s26 + $0x18] sm:$0xff] %vm443_vm2, %v430_v35 }
  0xed   : > { %455 = vst.msk [vmem:[%s686_s26 + $0x58] sm:$0xff] %vm443_vm2, %v438_v36  ;;  %446 = vst.msk [vmem:[%s686_s26 + $0x10] sm:$0xff] %vm443_vm2, %v429_v39  ;;  %v585_v45 = vpop.f32.mrb[4].mxu0 }
  0xee   : > { %454 = vst.msk [vmem:[%s686_s26 + $0x50] sm:$0xff] %vm443_vm2, %v437_v40  ;;  %v597_v46 = vpop.f32.mrb[4].mxu1  ;;  %v432_v47 = vmul.f32 %v585_v45, %v416_v41  ;;  %v352_v49 = vpop.f32.mrb[5].mxu0 }
  0xef   : > { %v440_v48 = vmul.f32 %v597_v46, %v424_v42  ;;  %v392_v50 = vpop.f32.mrb[5].mxu1  ;;  %v431_v51 = vmul.f32 %v415_v43, %v352_v49 }
  0xf0   : > { %v439_v52 = vmul.f32 %v423_v44, %v392_v50  ;;  %449 = vst.msk [vmem:[%s686_s26 + $0x28] sm:$0xff] %vm443_vm2, %v432_v47 }
  0xf1   : > { %457 = vst.msk [vmem:[%s686_s26 + $0x68] sm:$0xff] %vm443_vm2, %v440_v48  ;;  %448 = vst.msk [vmem:[%s686_s26 + $0x20] sm:$0xff] %vm443_vm2, %v431_v51  ;;  %v588_v57 = vpop.f32.mrb[6].mxu0 }
  0xf2   : > { %456 = vst.msk [vmem:[%s686_s26 + $0x60] sm:$0xff] %vm443_vm2, %v439_v52  ;;  %v600_v58 = vpop.f32.mrb[6].mxu1  ;;  %v434_v59 = vmul.f32 %v588_v57, %v418_v53  ;;  %v362_v61 = vpop.f32.mrb[7].mxu0 }
  0xf3   : > { %v442_v60 = vmul.f32 %v600_v58, %v426_v54  ;;  %v402_v62 = vpop.f32.mrb[7].mxu1  ;;  %v433_v63 = vmul.f32 %v417_v55, %v362_v61 }
  0xf4   : > { %v441_v0 = vmul.f32 %v425_v56, %v402_v62  ;;  %451 = vst.msk [vmem:[%s686_s26 + $0x38] sm:$0xff] %vm443_vm2, %v434_v59 }
  0xf5   : > { %459 = vst.msk [vmem:[%s686_s26 + $0x78] sm:$0xff] %vm443_vm2, %v442_v60  ;;  %450 = vst.msk [vmem:[%s686_s26 + $0x30] sm:$0xff] %vm443_vm2, %v433_v63 }
  0xf6   : > { %458 = vst.msk [vmem:[%s686_s26 + $0x70] sm:$0xff] %vm443_vm2, %v441_v0 }
  0xf7 PF: > { %s13_s12 = sadd.s32 1, %s617_s12  }
  0xf8   : > { %p10_p4 = scmp.ge.s32.totalorder %s13_s12, 6  }
  0xfa   :  { %12 = sbr.rel (!%p10_p4) target bundleno = 1 (0x1), region = 65 }

</bundles_post_ra>
